<compile_context>
chip_gen: v5e
topology: v5e:2x2
jax: 0.10.0
libtpu: 0.0.40
codegen_flags: <defaults>
</compile_context>

<pallas_src>
import jax
import jax.numpy as jnp
from jax import lax
from jax.experimental import pallas as pl
from jax.experimental.pallas import tpu as pltpu


_LANES = 1024        # lane-dense last dim: large multiple of 128
_BLOCK_ROWS = 256    # 256x1024 f32 = 1 MiB per tile; (in + out) * 2 buffers = 4 MiB
_SQRT3 = 1.7320508075688772
_INV_U16 = 1.0 / 65536.0


def _lsr(x, n, mask):
    """Logical right shift on int32 via arithmetic shift + mask (pure VPU ops)."""
    return (x >> n) & jnp.int32(mask)


def _hash_i32(x):
    """lowbias32 integer mixer on int32 (wrapping mul / xor / shift only)."""
    x = x ^ _lsr(x, 16, 0x0000FFFF)
    x = x * jnp.int32(0x7FEB352D)
    x = x ^ _lsr(x, 15, 0x0001FFFF)
    x = x * jnp.int32(-2073254261)          # 0x846CA68B as int32
    x = x ^ _lsr(x, 16, 0x0000FFFF)
    return x


def _gaussian_noise_kernel(seed_ref, std_ref, x_ref, o_ref):
    block_rows, lanes = x_ref.shape

    # Global element index of every element in this tile.  Counter-based RNG:
    # the randoms are identical for any grid/tiling and never repeat across tiles.
    row0 = pl.program_id(0) * block_rows
    r = lax.broadcasted_iota(jnp.int32, (block_rows, lanes), 0) + row0
    c = lax.broadcasted_iota(jnp.int32, (block_rows, lanes), 1)
    idx = r * jnp.int32(lanes) + c

    # Two decorrelated 32-bit hashes per element -> four 16-bit uniforms.
    h1 = _hash_i32(idx ^ seed_ref[0])
    h2 = _hash_i32(h1 ^ jnp.int32(-1640531527))   # golden-ratio salt 0x9E3779B9

    u = ((h1 & jnp.int32(0xFFFF)).astype(jnp.float32)
         + _lsr(h1, 16, 0xFFFF).astype(jnp.float32)
         + (h2 & jnp.int32(0xFFFF)).astype(jnp.float32)
         + _lsr(h2, 16, 0xFFFF).astype(jnp.float32))

    # Irwin-Hall(4): sum of four U(0,1) has mean 2, var 1/3 -> standardize to ~N(0,1).
    z = (u * jnp.float32(_INV_U16) - jnp.float32(2.0)) * jnp.float32(_SQRT3)

    noise = z * std_ref[0]
    # Final add happens in the output dtype: bf16 stays packed on v6e/v7x,
    # f32 inputs keep the f32 path (v5e-friendly).
    o_ref[...] = x_ref[...] + noise.astype(o_ref.dtype)


def gaussian_noise(x, std_scalar, seed_scalar, *, lanes=_LANES, block_rows=_BLOCK_ROWS):
    """out = x + N(0,1) * std, as a tiled Pallas kernel over a lane-dense 2-D view."""
    orig_shape, orig_dtype = x.shape, x.dtype
    n = x.size

    # Flatten to a lane-dense (rows, lanes) slab and pad so every grid step is a
    # full (brows, lanes) tile -> satisfies the (8,128) BlockSpec constraint for any
    # N/C/H/W (including H*W not a multiple of 128) and gives unmasked stores.
    rows = pl.cdiv(n, lanes)
    brows = min(block_rows, max(8, ((rows + 7) // 8) * 8))
    padded_rows = pl.cdiv(rows, brows) * brows
    flat = x.reshape(-1)
    pad = padded_rows * lanes - n
    if pad:
        flat = jnp.pad(flat, (0, pad))
    x2 = flat.reshape(padded_rows, lanes)

    seed_arr = jnp.asarray([seed_scalar], dtype=jnp.int32)
    std_arr = jnp.asarray([std_scalar], dtype=jnp.float32)

    out2 = pl.pallas_call(
        _gaussian_noise_kernel,
        out_shape=jax.ShapeDtypeStruct(x2.shape, x2.dtype),
        grid=(padded_rows // brows,),
        in_specs=[
            pl.BlockSpec(memory_space=pltpu.MemorySpace.SMEM),   # seed (scalar)
            pl.BlockSpec(memory_space=pltpu.MemorySpace.SMEM),   # std  (scalar)
            pl.BlockSpec((brows, lanes), lambda i: (i, 0)),      # image row tile
        ],
        out_specs=pl.BlockSpec((brows, lanes), lambda i: (i, 0)),
        input_output_aliases={2: 0},   # in-place perturbation; x2 is a fresh temp
        compiler_params=pltpu.CompilerParams(
            dimension_semantics=("parallel",),      # independent tiles -> 2 TCs on v7x
            vmem_limit_bytes=32 * 1024 * 1024,      # 4 MiB buffers + RNG temps, safe on v7x
        ),
    )(seed_arr, std_arr, x2)

    return out2.reshape(-1)[:n].reshape(orig_shape).astype(orig_dtype)


def gaussian_noise_forward(noised_and_cover, std_max, key):
    """Mirror of GaussianNoise.forward: perturbs element [0] of the list."""
    k_std, k_seed = jax.random.split(key)
    # random_float(0, std_max): the noise std is drawn uniformly once per call.
    gaussian_std = jax.random.uniform(k_std, (), minval=0.0, maxval=std_max)
    seed = jax.random.randint(k_seed, (), 0, 2**31 - 1, dtype=jnp.int32)
    noised_and_cover[0] = gaussian_noise(noised_and_cover[0], gaussian_std, seed)
    return noised_and_cover


if __name__ == "__main__":
    key = jax.random.PRNGKey(0)
    k_img, k_cov, k_fwd = jax.random.split(key, 3)

    # Small NCHW image pair, like the HiDDeN noise-layer interface.
    noised = jax.random.normal(k_img, (2, 4, 16, 16), dtype=jnp.float32)
    cover = jax.random.normal(k_cov, (2, 4, 16, 16), dtype=jnp.float32)

    # Reproduce the std the forward pass will draw (same key split).
    k_std, _ = jax.random.split(k_fwd)
    expected_std = float(jax.random.uniform(k_std, (), minval=0.0, maxval=0.1))

    out_list = gaussian_noise_forward([noised, cover], std_max=0.1, key=k_fwd)
    distorted = jax.block_until_ready(out_list[0])

    assert distorted.shape == noised.shape
    assert distorted.dtype == noised.dtype
    assert bool(jnp.all(jnp.isfinite(distorted)))

    delta = distorted - noised
    # std <= 0.1 and |z| <= 2*sqrt(3): the perturbation is small and bounded.
    assert float(jnp.max(jnp.abs(delta))) < 1.0
    # Noise statistics roughly match the drawn std (2048 samples, generous tolerance).
    emp_std = float(jnp.std(delta))
    emp_mean = float(jnp.mean(delta))
    assert 0.7 * expected_std < emp_std < 1.3 * expected_std
    assert abs(emp_mean) < 0.3 * expected_std

    print("KERNEL_OK")
</pallas_src>

<mosaic_0001>
module attributes {stable_mosaic.version = 11 : i64} {
  func.func @_gaussian_noise_kernel(%arg0: i32, %arg1: memref<1xi32, #tpu.memory_space<smem>>, %arg2: memref<1xf32, #tpu.memory_space<smem>>, %arg3: memref<8x1024xf32, #tpu.memory_space<vmem>>, %arg4: memref<8x1024xf32, #tpu.memory_space<vmem>>) attributes {dimension_semantics = [#tpu.dimension_semantics<parallel>], iteration_bounds = array<i64: 1>, scalar_prefetch = 0 : i64, scratch_operands = 0 : i64, tpu.core_type = #tpu.core_type<tc>, window_params = [{transform_indices = @transform_0, window_bounds = array<i64: 1>}, {transform_indices = @transform_1, window_bounds = array<i64: 1>}, {transform_indices = @transform_2, window_bounds = array<i64: 8, 1024>}, {transform_indices = @transform_3, window_bounds = array<i64: 8, 1024>}]} {
    %c8_i32 = arith.constant 8 : i32
    %0 = arith.muli %arg0, %c8_i32 : i32
    %1 = tpu.iota {dimensions = array<i32: 0>} : vector<8x1024xi32>
    %2 = vector.broadcast %0 : i32 to vector<8x1024xi32>
    %3 = arith.addi %1, %2 : vector<8x1024xi32>
    %4 = tpu.iota {dimensions = array<i32: 1>} : vector<8x1024xi32>
    %c1024_i32 = arith.constant 1024 : i32
    %5 = vector.broadcast %c1024_i32 : i32 to vector<8x1024xi32>
    %6 = arith.muli %3, %5 : vector<8x1024xi32>
    %7 = arith.addi %6, %4 : vector<8x1024xi32>
    %c0 = arith.constant 0 : index
    %8 = memref.load %arg1[%c0] : memref<1xi32, #tpu.memory_space<smem>>
    %9 = vector.broadcast %8 : i32 to vector<8x1024xi32>
    %10 = arith.xori %7, %9 : vector<8x1024xi32>
    %c16_i32 = arith.constant 16 : i32
    %11 = vector.broadcast %c16_i32 : i32 to vector<8x1024xi32>
    %12 = arith.shrsi %10, %11 : vector<8x1024xi32>
    %c65535_i32 = arith.constant 65535 : i32
    %13 = vector.broadcast %c65535_i32 : i32 to vector<8x1024xi32>
    %14 = arith.andi %12, %13 : vector<8x1024xi32>
    %15 = arith.xori %10, %14 : vector<8x1024xi32>
    %c2146121005_i32 = arith.constant 2146121005 : i32
    %16 = vector.broadcast %c2146121005_i32 : i32 to vector<8x1024xi32>
    %17 = arith.muli %15, %16 : vector<8x1024xi32>
    %c15_i32 = arith.constant 15 : i32
    %18 = vector.broadcast %c15_i32 : i32 to vector<8x1024xi32>
    %19 = arith.shrsi %17, %18 : vector<8x1024xi32>
    %c131071_i32 = arith.constant 131071 : i32
    %20 = vector.broadcast %c131071_i32 : i32 to vector<8x1024xi32>
    %21 = arith.andi %19, %20 : vector<8x1024xi32>
    %22 = arith.xori %17, %21 : vector<8x1024xi32>
    %c-2073254261_i32 = arith.constant -2073254261 : i32
    %23 = vector.broadcast %c-2073254261_i32 : i32 to vector<8x1024xi32>
    %24 = arith.muli %22, %23 : vector<8x1024xi32>
    %c16_i32_0 = arith.constant 16 : i32
    %25 = vector.broadcast %c16_i32_0 : i32 to vector<8x1024xi32>
    %26 = arith.shrsi %24, %25 : vector<8x1024xi32>
    %c65535_i32_1 = arith.constant 65535 : i32
    %27 = vector.broadcast %c65535_i32_1 : i32 to vector<8x1024xi32>
    %28 = arith.andi %26, %27 : vector<8x1024xi32>
    %29 = arith.xori %24, %28 : vector<8x1024xi32>
    %c-1640531527_i32 = arith.constant -1640531527 : i32
    %30 = vector.broadcast %c-1640531527_i32 : i32 to vector<8x1024xi32>
    %31 = arith.xori %29, %30 : vector<8x1024xi32>
    %c16_i32_2 = arith.constant 16 : i32
    %32 = vector.broadcast %c16_i32_2 : i32 to vector<8x1024xi32>
    %33 = arith.shrsi %31, %32 : vector<8x1024xi32>
    %c65535_i32_3 = arith.constant 65535 : i32
    %34 = vector.broadcast %c65535_i32_3 : i32 to vector<8x1024xi32>
    %35 = arith.andi %33, %34 : vector<8x1024xi32>
    %36 = arith.xori %31, %35 : vector<8x1024xi32>
    %c2146121005_i32_4 = arith.constant 2146121005 : i32
    %37 = vector.broadcast %c2146121005_i32_4 : i32 to vector<8x1024xi32>
    %38 = arith.muli %36, %37 : vector<8x1024xi32>
    %c15_i32_5 = arith.constant 15 : i32
    %39 = vector.broadcast %c15_i32_5 : i32 to vector<8x1024xi32>
    %40 = arith.shrsi %38, %39 : vector<8x1024xi32>
    %c131071_i32_6 = arith.constant 131071 : i32
    %41 = vector.broadcast %c131071_i32_6 : i32 to vector<8x1024xi32>
    %42 = arith.andi %40, %41 : vector<8x1024xi32>
    %43 = arith.xori %38, %42 : vector<8x1024xi32>
    %c-2073254261_i32_7 = arith.constant -2073254261 : i32
    %44 = vector.broadcast %c-2073254261_i32_7 : i32 to vector<8x1024xi32>
    %45 = arith.muli %43, %44 : vector<8x1024xi32>
    %c16_i32_8 = arith.constant 16 : i32
    %46 = vector.broadcast %c16_i32_8 : i32 to vector<8x1024xi32>
    %47 = arith.shrsi %45, %46 : vector<8x1024xi32>
    %c65535_i32_9 = arith.constant 65535 : i32
    %48 = vector.broadcast %c65535_i32_9 : i32 to vector<8x1024xi32>
    %49 = arith.andi %47, %48 : vector<8x1024xi32>
    %50 = arith.xori %45, %49 : vector<8x1024xi32>
    %c65535_i32_10 = arith.constant 65535 : i32
    %51 = vector.broadcast %c65535_i32_10 : i32 to vector<8x1024xi32>
    %52 = arith.andi %29, %51 : vector<8x1024xi32>
    %53 = arith.sitofp %52 : vector<8x1024xi32> to vector<8x1024xf32>
    %c16_i32_11 = arith.constant 16 : i32
    %54 = vector.broadcast %c16_i32_11 : i32 to vector<8x1024xi32>
    %55 = arith.shrsi %29, %54 : vector<8x1024xi32>
    %c65535_i32_12 = arith.constant 65535 : i32
    %56 = vector.broadcast %c65535_i32_12 : i32 to vector<8x1024xi32>
    %57 = arith.andi %55, %56 : vector<8x1024xi32>
    %58 = arith.sitofp %57 : vector<8x1024xi32> to vector<8x1024xf32>
    %59 = arith.addf %53, %58 : vector<8x1024xf32>
    %c65535_i32_13 = arith.constant 65535 : i32
    %60 = vector.broadcast %c65535_i32_13 : i32 to vector<8x1024xi32>
    %61 = arith.andi %50, %60 : vector<8x1024xi32>
    %62 = arith.sitofp %61 : vector<8x1024xi32> to vector<8x1024xf32>
    %63 = arith.addf %59, %62 : vector<8x1024xf32>
    %c16_i32_14 = arith.constant 16 : i32
    %64 = vector.broadcast %c16_i32_14 : i32 to vector<8x1024xi32>
    %65 = arith.shrsi %50, %64 : vector<8x1024xi32>
    %c65535_i32_15 = arith.constant 65535 : i32
    %66 = vector.broadcast %c65535_i32_15 : i32 to vector<8x1024xi32>
    %67 = arith.andi %65, %66 : vector<8x1024xi32>
    %68 = arith.sitofp %67 : vector<8x1024xi32> to vector<8x1024xf32>
    %69 = arith.addf %63, %68 : vector<8x1024xf32>
    %cst = arith.constant 1.52587891E-5 : f32
    %70 = vector.broadcast %cst : f32 to vector<8x1024xf32>
    %71 = arith.mulf %69, %70 : vector<8x1024xf32>
    %cst_16 = arith.constant 2.000000e+00 : f32
    %72 = vector.broadcast %cst_16 : f32 to vector<8x1024xf32>
    %73 = arith.subf %71, %72 : vector<8x1024xf32>
    %cst_17 = arith.constant 1.73205078 : f32
    %74 = vector.broadcast %cst_17 : f32 to vector<8x1024xf32>
    %75 = arith.mulf %73, %74 : vector<8x1024xf32>
    %c0_18 = arith.constant 0 : index
    %76 = memref.load %arg2[%c0_18] : memref<1xf32, #tpu.memory_space<smem>>
    %77 = vector.broadcast %76 : f32 to vector<8x1024xf32>
    %78 = arith.mulf %75, %77 : vector<8x1024xf32>
    %c0_19 = arith.constant 0 : index
    %c0_20 = arith.constant 0 : index
    %79 = vector.load %arg3[%c0_19, %c0_20] : memref<8x1024xf32, #tpu.memory_space<vmem>>, vector<8x1024xf32>
    %80 = arith.addf %79, %78 : vector<8x1024xf32>
    %c0_21 = arith.constant 0 : index
    %c0_22 = arith.constant 0 : index
    %81 = vector.load %arg4[%c0_21, %c0_22] : memref<8x1024xf32, #tpu.memory_space<vmem>>, vector<8x1024xf32>
    tpu.vector_store %arg4[%c0_21, %c0_22], %80 {strides = array<i32>} : memref<8x1024xf32, #tpu.memory_space<vmem>>, vector<8x1024xf32>,
    return
  }
  func.func @transform_0(%arg0: i32) -> i32 {
    %c0_i32 = arith.constant 0 : i32
    %c0_i32_0 = arith.constant 0 : i32
    return %c0_i32 : i32
  }
  func.func @transform_1(%arg0: i32) -> i32 {
    %c0_i32 = arith.constant 0 : i32
    %c0_i32_0 = arith.constant 0 : i32
    return %c0_i32 : i32
  }
  func.func @transform_2(%arg0: i32) -> (i32, i32) {
    %c0_i32 = arith.constant 0 : i32
    %c0_i32_0 = arith.constant 0 : i32
    return %arg0, %c0_i32 : i32, i32
  }
  func.func @transform_3(%arg0: i32) -> (i32, i32) {
    %c0_i32 = arith.constant 0 : i32
    %c0_i32_0 = arith.constant 0 : i32
    return %arg0, %c0_i32 : i32, i32
  }
}

</mosaic_0001>

<bundles_post_ra>
// kernel: tpu_custom_call.1
= control target key start
LH: loop header
LB: loop body
LE: loop exit
PB: predicated region body
PF: predicated region fallthrough
CT: control target
= control target key end

     0   :  { %10 = vsyncpa [#allocation5], 0  ;;  %s623_s0 = inlined_call_operand.<no memory space> [shape: s32[1], index: 0, kind: input, shape index: {}]   ;;  %s624_s1 = inlined_call_operand.<no memory space> [shape: f32[1], index: 1, kind: input, shape index: {}]   ;;  %s625_s2 = inlined_call_operand.hbm [shape: f32[8,1024], index: 2, kind: input, shape index: {}, may-alias: {2,3}]   ;;  %s626_s3 = inlined_call_operand.hbm [shape: f32[8,1024], index: 3, kind: output, shape index: {}, may-alias: {2,3}]  }
   0x1   :  { %11 = vsyncpa [#allocation6], 0  ;;  %s21_s14 = sshll.u32 %s625_s2, 4  ;;  %s553_s15 = smov [#allocation4]   ;;  %s22_s14 = int_to_ptr.hbm [resolvable:$true] %s21_s14 }
   0x2   :  { %s23_s16 = sshll.u32 %s553_s15, 4  ;;  %s24_s16 = int_to_ptr.vmem [resolvable:$true] %s23_s16 }
   0x3   :  { %26 = dma.hbm_to_vmem [thread:$0]  %s22_s14, 1024, %s24_s16, [#allocation5]  }
   0x4   :  { %549 = dma.done.wait [#allocation5], 1024  }
   0x5   :  { %550 = vsyncadd [#allocation5], 4294966272  ;;  %v32_v0 = vlaneseq  ;;  %v55_v3 = vstv %s623_s0  ;;  %s417_s22 = sshll.u32 %s626_s3, 4  ;;  %s418_s22 = int_to_ptr.hbm [resolvable:$true] %s417_s22 }
   0x7   :  { %v33_v1 = vshrl.u32 %v32_v0, 7  ;;  %v37_v2 = vand.u32 127, %v32_v0 }
   0x9   :  { %v45_v4 = vmul.u32 1024, %v33_v1  ;;  %v38_v5 = vadd.s32 128, %v37_v2  ;;  %v39_v6 = vadd.s32 256, %v37_v2  ;;  %v40_v7 = vadd.s32 384, %v37_v2 }
   0xa   :  { %v41_v8 = vadd.s32 512, %v37_v2  ;;  %v42_v9 = vadd.s32 640, %v37_v2  ;;  %v43_v10 = vadd.s32 768, %v37_v2  ;;  %v44_v11 = vadd.s32 896, %v37_v2 }
   0xb   :  { %v46_v12 = vadd.s32 %v45_v4, %v37_v2  ;;  %v47_v13 = vadd.s32 %v45_v4, %v38_v5  ;;  %v48_v14 = vadd.s32 %v45_v4, %v39_v6  ;;  %v49_v15 = vadd.s32 %v45_v4, %v40_v7 }
   0xc   :  { %v50_v16 = vadd.s32 %v45_v4, %v41_v8  ;;  %v51_v17 = vadd.s32 %v45_v4, %v42_v9  ;;  %v52_v18 = vadd.s32 %v45_v4, %v43_v10  ;;  %v53_v19 = vadd.s32 %v45_v4, %v44_v11 }
   0xd   :  { %v56_v20 = vxor.u32 %v55_v3, %v46_v12  ;;  %v57_v21 = vxor.u32 %v55_v3, %v47_v13  ;;  %v58_v22 = vxor.u32 %v55_v3, %v48_v14  ;;  %v59_v23 = vxor.u32 %v55_v3, %v49_v15 }
   0xe   :  { %v60_v24 = vxor.u32 %v55_v3, %v50_v16  ;;  %v61_v25 = vxor.u32 %v55_v3, %v51_v17  ;;  %v62_v26 = vxor.u32 %v55_v3, %v52_v18  ;;  %v63_v27 = vxor.u32 %v55_v3, %v53_v19 }
   0xf   :  { %v427_v28 = vshrl.u32 %v56_v20, 16  ;;  %v428_v29 = vshrl.u32 %v57_v21, 16  ;;  %v429_v30 = vshrl.u32 %v58_v22, 16  ;;  %v430_v31 = vshrl.u32 %v59_v23, 16 }
  0x10   :  { %v431_v32 = vshrl.u32 %v60_v24, 16  ;;  %v432_v33 = vshrl.u32 %v61_v25, 16  ;;  %v433_v34 = vshrl.u32 %v62_v26, 16  ;;  %v434_v35 = vshrl.u32 %v63_v27, 16 }
  0x11   :  { %v80_v36 = vxor.u32 %v427_v28, %v56_v20  ;;  %v81_v37 = vxor.u32 %v428_v29, %v57_v21  ;;  %v82_v38 = vxor.u32 %v429_v30, %v58_v22  ;;  %v83_v39 = vxor.u32 %v430_v31, %v59_v23 }
  0x12   :  { %v84_v40 = vxor.u32 %v431_v32, %v60_v24  ;;  %v85_v41 = vxor.u32 %v432_v33, %v61_v25  ;;  %v86_v42 = vxor.u32 %v433_v34, %v62_v26  ;;  %v87_v43 = vxor.u32 %v434_v35, %v63_v27 }
  0x13   :  { %v88_v44 = vmul.u32 2146121005, %v80_v36  ;;  %v89_v45 = vmul.u32 2146121005, %v81_v37  ;;  %v90_v46 = vmul.u32 2146121005, %v82_v38  ;;  %v589_v20 = vstv %s624_s1 }
  0x14   :  { %v91_v47 = vmul.u32 2146121005, %v83_v39  ;;  %v92_v48 = vmul.u32 2146121005, %v84_v40  ;;  %v93_v49 = vmul.u32 2146121005, %v85_v41 }
  0x15   :  { %v435_v50 = vshrl.u32 %v88_v44, 15  ;;  %v436_v51 = vshrl.u32 %v89_v45, 15  ;;  %v437_v52 = vshrl.u32 %v90_v46, 15  ;;  %v94_v53 = vmul.u32 2146121005, %v86_v42  ;;  %s554_s1 = smov [#allocation7]  }
  0x16   :  { %v438_v54 = vshrl.u32 %v91_v47, 15  ;;  %v439_v55 = vshrl.u32 %v92_v48, 15  ;;  %v440_v56 = vshrl.u32 %v93_v49, 15  ;;  %v95_v57 = vmul.u32 2146121005, %v87_v43  ;;  %s415_s19 = sshll.u32 %s554_s1, 4  ;;  %s416_s19 = int_to_ptr.vmem [resolvable:$true] %s415_s19 }
  0x17   :  { %v112_v58 = vxor.u32 %v435_v50, %v88_v44  ;;  %v113_v59 = vxor.u32 %v436_v51, %v89_v45  ;;  %v114_v60 = vxor.u32 %v437_v52, %v90_v46  ;;  %v441_v61 = vshrl.u32 %v94_v53, 15 }
  0x18   :  { %v115_v62 = vxor.u32 %v438_v54, %v91_v47  ;;  %v116_v63 = vxor.u32 %v439_v55, %v92_v48  ;;  %v117_v0 = vxor.u32 %v440_v56, %v93_v49  ;;  %v442_v1 = vshrl.u32 %v95_v57, 15 }
  0x19   :  { %v120_v2 = vmul.u32 2221713035, %v112_v58  ;;  %v121_v3 = vmul.u32 2221713035, %v113_v59  ;;  %v122_v4 = vmul.u32 2221713035, %v114_v60  ;;  %v581_v5 = vxor.u32 %v441_v61, %v94_v53 }
  0x1a   :  { %v123_v6 = vmul.u32 2221713035, %v115_v62  ;;  %v124_v7 = vmul.u32 2221713035, %v116_v63  ;;  %v125_v8 = vmul.u32 2221713035, %v117_v0  ;;  %v583_v15 = vxor.u32 %v442_v1, %v95_v57 }
  0x1b   :  { %v443_v9 = vshrl.u32 %v120_v2, 16  ;;  %v444_v10 = vshrl.u32 %v121_v3, 16  ;;  %v445_v11 = vshrl.u32 %v122_v4, 16  ;;  %v126_v19 = vmul.u32 2221713035, %v581_v5 }
  0x1c   :  { %v446_v12 = vshrl.u32 %v123_v6, 16  ;;  %v447_v13 = vshrl.u32 %v124_v7, 16  ;;  %v448_v14 = vshrl.u32 %v125_v8, 16 }
  0x1d   :  { %v144_v16 = vxor.u32 %v443_v9, %v120_v2  ;;  %v145_v17 = vxor.u32 %v444_v10, %v121_v3  ;;  %v146_v18 = vxor.u32 %v445_v11, %v122_v4  ;;  %v449_v35 = vshrl.u32 %v126_v19, 16 }
  0x1e   :  { %v147_v21 = vxor.u32 %v446_v12, %v123_v6  ;;  %v148_v22 = vxor.u32 %v447_v13, %v124_v7  ;;  %v591_v23 = vxor.u32 %v448_v14, %v125_v8 }
  0x1f   :  { %v152_v24 = vxor.u32 2654435769, %v144_v16  ;;  %v248_v25 = vand.u32 65535, %v144_v16  ;;  %v475_v26 = vshrl.u32 %v144_v16, 16  ;;  %v249_v27 = vand.u32 65535, %v145_v17 }
  0x20   :  { %v153_v28 = vxor.u32 2654435769, %v145_v17  ;;  %v476_v29 = vshrl.u32 %v145_v17, 16  ;;  %v154_v30 = vxor.u32 2654435769, %v146_v18  ;;  %v250_v31 = vand.u32 65535, %v146_v18 }
  0x21   :  { %v451_v32 = vshrl.u32 %v152_v24, 16  ;;  %v256_v33 = vcvt.s32.f32 %v248_v25  ;;  %v280_v34 = vcvt.s32.f32 %v475_v26  ;;  %v257_v37 = vcvt.s32.f32 %v249_v27 }
  0x22   :  { %v452_v36 = vshrl.u32 %v153_v28, 16  ;;  %v281_v38 = vcvt.s32.f32 %v476_v29  ;;  %v453_v39 = vshrl.u32 %v154_v30, 16  ;;  %v258_v41 = vcvt.s32.f32 %v250_v31 }
  0x23   :  { %v176_v40 = vxor.u32 %v451_v32, %v152_v24  ;;  %v477_v42 = vshrl.u32 %v146_v18, 16  ;;  %v155_v43 = vxor.u32 2654435769, %v147_v21  ;;  %v595_v44 = vadd.f32 %v280_v34, %v256_v33 }
  0x24   :  { %v177_v45 = vxor.u32 %v452_v36, %v153_v28  ;;  %v178_v46 = vxor.u32 %v453_v39, %v154_v30  ;;  %v251_v47 = vand.u32 65535, %v147_v21  ;;  %v478_v51 = vshrl.u32 %v147_v21, 16 }
  0x25   :  { %v184_v48 = vmul.u32 2146121005, %v176_v40  ;;  %v282_v49 = vcvt.s32.f32 %v477_v42  ;;  %v454_v50 = vshrl.u32 %v155_v43, 16  ;;  %v597_v53 = vadd.f32 %v281_v38, %v257_v37 }
  0x26   :  { %v185_v52 = vmul.u32 2146121005, %v177_v45  ;;  %v186_v54 = vmul.u32 2146121005, %v178_v46  ;;  %v156_v55 = vxor.u32 2654435769, %v148_v22  ;;  %v259_v58 = vcvt.s32.f32 %v251_v47 }
  0x27   :  { %v459_v56 = vshrl.u32 %v184_v48, 15  ;;  %v179_v57 = vxor.u32 %v454_v50, %v155_v43  ;;  %v283_v59 = vcvt.s32.f32 %v478_v51  ;;  %v252_v63 = vand.u32 65535, %v148_v22 }
  0x28   :  { %v460_v60 = vshrl.u32 %v185_v52, 15  ;;  %v461_v61 = vshrl.u32 %v186_v54, 15  ;;  %v455_v62 = vshrl.u32 %v156_v55, 16  ;;  %v290_v1 = vadd.f32 %v282_v49, %v258_v41 }
  0x29   :  { %v208_v0 = vxor.u32 %v459_v56, %v184_v48  ;;  %v187_v2 = vmul.u32 2146121005, %v179_v57  ;;  %v479_v3 = vshrl.u32 %v148_v22, 16  ;;  %v260_v8 = vcvt.s32.f32 %v252_v63 }
  0x2a   :  { %v209_v4 = vxor.u32 %v460_v60, %v185_v52  ;;  %v210_v6 = vxor.u32 %v461_v61, %v186_v54  ;;  %v180_v7 = vxor.u32 %v455_v62, %v156_v55  ;;  %v157_v12 = vxor.u32 2654435769, %v591_v23 }
  0x2b   :  { %v216_v9 = vmul.u32 2221713035, %v208_v0  ;;  %v462_v10 = vshrl.u32 %v187_v2, 15  ;;  %v284_v11 = vcvt.s32.f32 %v479_v3  ;;  %v291_v16 = vadd.f32 %v283_v59, %v259_v58 }
  0x2c   :  { %v217_v13 = vmul.u32 2221713035, %v209_v4  ;;  %v218_v14 = vmul.u32 2221713035, %v210_v6  ;;  %v188_v17 = vmul.u32 2146121005, %v180_v7  ;;  %v602_v25 = vxor.u32 %v449_v35, %v126_v19 }
  0x2d   :  { %v467_v18 = vshrl.u32 %v216_v9, 16  ;;  %v211_v21 = vxor.u32 %v462_v10, %v187_v2  ;;  %v456_v24 = vshrl.u32 %v157_v12, 16  ;;  %v292_v28 = vadd.f32 %v284_v11, %v260_v8 }
  0x2e   :  { %v468_v22 = vshrl.u32 %v217_v13, 16  ;;  %v469_v26 = vshrl.u32 %v218_v14, 16  ;;  %v463_v27 = vshrl.u32 %v188_v17, 15  ;;  %v253_v32 = vand.u32 65535, %v591_v23 }
  0x2f   :  { %v240_v29 = vxor.u32 %v467_v18, %v216_v9  ;;  %v219_v30 = vmul.u32 2221713035, %v211_v21  ;;  %v181_v31 = vxor.u32 %v456_v24, %v157_v12  ;;  %v480_v37 = vshrl.u32 %v591_v23, 16 }
  0x30   :  { %v241_v33 = vxor.u32 %v468_v22, %v217_v13  ;;  %v242_v34 = vxor.u32 %v469_v26, %v218_v14  ;;  %v212_v36 = vxor.u32 %v463_v27, %v188_v17  ;;  %v261_v59 = vcvt.s32.f32 %v253_v32 }
  0x31   :  { %v296_v38 = vand.u32 65535, %v240_v29  ;;  %v483_v39 = vshrl.u32 %v240_v29, 16  ;;  %v470_v40 = vshrl.u32 %v219_v30, 16  ;;  %v189_v5 = vmul.u32 2146121005, %v181_v31  ;;  %v386_v29 = vld [vmem:[#allocation4] sm:$0xff] }
  0x32   :  { %v297_v19 = vand.u32 65535, %v241_v33  ;;  %v484_v35 = vshrl.u32 %v241_v33, 16  ;;  %v298_v41 = vand.u32 65535, %v242_v34  ;;  %v485_v42 = vshrl.u32 %v242_v34, 16 }
  0x33   :  { %v304_v43 = vcvt.s32.f32 %v296_v38  ;;  %v336_v45 = vcvt.s32.f32 %v483_v39  ;;  %v243_v46 = vxor.u32 %v470_v40, %v219_v30  ;;  %v220_v47 = vmul.u32 2221713035, %v212_v36  ;;  %v387_v36 = vld [vmem:[#allocation4 + $0x8] sm:$0xff] }
  0x34   :  { %v305_v48 = vcvt.s32.f32 %v297_v19  ;;  %v337_v49 = vcvt.s32.f32 %v484_v35  ;;  %v306_v50 = vcvt.s32.f32 %v298_v41  ;;  %v338_v51 = vcvt.s32.f32 %v485_v42 }
  0x35   :  { %v312_v52 = vadd.f32 %v304_v43, %v595_v44  ;;  %v299_v54 = vand.u32 65535, %v243_v46  ;;  %v486_v23 = vshrl.u32 %v243_v46, 16  ;;  %v471_v55 = vshrl.u32 %v220_v47, 16 }
  0x36   :  { %v313_v56 = vadd.f32 %v305_v48, %v597_v53  ;;  %v314_v57 = vadd.f32 %v306_v50, %v290_v1  ;;  %v464_v58 = vshrl.u32 %v189_v5, 15  ;;  %v285_v4 = vcvt.s32.f32 %v480_v37  ;;  %v388_v37 = vld [vmem:[#allocation4 + $0x10] sm:$0xff] }
  0x37   :  { %v344_v60 = vadd.f32 %v336_v45, %v312_v52  ;;  %v307_v61 = vcvt.s32.f32 %v299_v54  ;;  %v339_v62 = vcvt.s32.f32 %v486_v23  ;;  %v244_v63 = vxor.u32 %v471_v55, %v220_v47  ;;  %v389_v47 = vld [vmem:[#allocation4 + $0x18] sm:$0xff] }
  0x38   :  { %v345_v0 = vadd.f32 %v337_v49, %v313_v56  ;;  %v346_v2 = vadd.f32 %v338_v51, %v314_v57  ;;  %v213_v3 = vxor.u32 %v464_v58, %v189_v5  ;;  %v158_v53 = vxor.u32 2654435769, %v602_v25 }
  0x39   :  { %v352_v6 = vmul.f32 1.5258789e-05, %v344_v60  ;;  %v315_v7 = vadd.f32 %v307_v61, %v291_v16  ;;  %v300_v8 = vand.u32 65535, %v244_v63  ;;  %v487_v44 = vshrl.u32 %v244_v63, 16  ;;  %v390_v60 = vld [vmem:[#allocation4 + $0x20] sm:$0xff] }
  0x3a   :  { %v353_v9 = vmul.f32 1.5258789e-05, %v345_v0  ;;  %v354_v10 = vmul.f32 1.5258789e-05, %v346_v2  ;;  %v221_v11 = vmul.u32 2221713035, %v213_v3  ;;  %v457_v24 = vshrl.u32 %v158_v53, 16 }
  0x3b   :  { %v491_v1 = vadd.f32 -2.0, %v352_v6  ;;  %v347_v12 = vadd.f32 %v339_v62, %v315_v7  ;;  %v308_v13 = vcvt.s32.f32 %v300_v8  ;;  %v340_v14 = vcvt.s32.f32 %v487_v44 }
  0x3c   :  { %v492_v17 = vadd.f32 -2.0, %v353_v9  ;;  %v493_v18 = vadd.f32 -2.0, %v354_v10  ;;  %v472_v21 = vshrl.u32 %v221_v11, 16  ;;  %v127_v16 = vmul.u32 2221713035, %v583_v15 }
  0x3d   :  { %v368_v22 = vmul.f32 1.7320508, %v491_v1  ;;  %v355_v26 = vmul.f32 1.5258789e-05, %v347_v12  ;;  %v316_v27 = vadd.f32 %v308_v13, %v292_v28  ;;  %v182_v33 = vxor.u32 %v457_v24, %v158_v53 }
  0x3e   :  { %v369_v30 = vmul.f32 1.7320508, %v492_v17  ;;  %v370_v31 = vmul.f32 1.7320508, %v493_v18  ;;  %v245_v32 = vxor.u32 %v472_v21, %v221_v11  ;;  %v293_v40 = vadd.f32 %v285_v4, %v261_v59 }
  0x3f   :  { %v378_v34 = vmul.f32 %v589_v20, %v368_v22  ;;  %v494_v38 = vadd.f32 -2.0, %v355_v26  ;;  %v348_v39 = vadd.f32 %v340_v14, %v316_v27  ;;  %v190_v43 = vmul.u32 2146121005, %v182_v33 }
  0x40   :  { %v379_v5 = vmul.f32 %v589_v20, %v369_v30  ;;  %v380_v19 = vmul.f32 %v589_v20, %v370_v31  ;;  %v301_v35 = vand.u32 65535, %v245_v32  ;;  %v488_v28 = vshrl.u32 %v245_v32, 16 }
  0x41   :  { %v394_v41 = vadd.f32 %v386_v29, %v378_v34  ;;  %v371_v15 = vmul.f32 1.7320508, %v494_v38  ;;  %v356_v42 = vmul.f32 1.5258789e-05, %v348_v39  ;;  %v465_v52 = vshrl.u32 %v190_v43, 15 }
  0x42   :  { %v395_v45 = vadd.f32 %v387_v36, %v379_v5  ;;  %v396_v46 = vadd.f32 %v388_v37, %v380_v19  ;;  %v309_v48 = vcvt.s32.f32 %v301_v35  ;;  %v341_v49 = vcvt.s32.f32 %v488_v28 }
  0x43   :  { %402 = vst [vmem:[#allocation7] sm:$0xff] %v394_v41  ;;  %v381_v50 = vmul.f32 %v589_v20, %v371_v15  ;;  %v495_v51 = vadd.f32 -2.0, %v356_v42  ;;  %v254_v23 = vand.u32 65535, %v602_v25  ;;  %v450_v55 = vshrl.u32 %v127_v16, 16 }
  0x44   :  { %403 = vst [vmem:[#allocation7 + $0x8] sm:$0xff] %v395_v45  ;;  %v317_v54 = vadd.f32 %v309_v48, %v293_v40  ;;  %v214_v58 = vxor.u32 %v465_v52, %v190_v43  ;;  %v481_v59 = vshrl.u32 %v602_v25, 16  ;;  %v391_v25 = vld [vmem:[#allocation4 + $0x28] sm:$0xff]  ;;  %v392_v40 = vld [vmem:[#allocation4 + $0x30] sm:$0xff] }
  0x45   :  { %404 = vst [vmem:[#allocation7 + $0x10] sm:$0xff] %v396_v46  ;;  %v397_v56 = vadd.f32 %v389_v47, %v381_v50  ;;  %v372_v57 = vmul.f32 1.7320508, %v495_v51  ;;  %v151_v62 = vxor.u32 %v450_v55, %v127_v16  ;;  %v262_v7 = vcvt.s32.f32 %v254_v23 }
  0x46   :  { %v349_v61 = vadd.f32 %v341_v49, %v317_v54  ;;  %v222_v0 = vmul.u32 2221713035, %v214_v58  ;;  %v286_v8 = vcvt.s32.f32 %v481_v59  ;;  %v393_v49 = vld [vmem:[#allocation4 + $0x38] sm:$0xff] }
  0x47   :  { %405 = vst [vmem:[#allocation7 + $0x18] sm:$0xff] %v397_v56  ;;  %v382_v63 = vmul.f32 %v589_v20, %v372_v57  ;;  %v159_v3 = vxor.u32 2654435769, %v151_v62  ;;  %v255_v16 = vand.u32 65535, %v151_v62  ;;  %v482_v29 = vshrl.u32 %v151_v62, 16 }
  0x48   :  { %v357_v2 = vmul.f32 1.5258789e-05, %v349_v61  ;;  %v473_v6 = vshrl.u32 %v222_v0, 16  ;;  %v294_v1 = vadd.f32 %v286_v8, %v262_v7 }
  0x49   :  { %v398_v4 = vadd.f32 %v390_v60, %v382_v63  ;;  %v458_v9 = vshrl.u32 %v159_v3, 16  ;;  %v263_v34 = vcvt.s32.f32 %v255_v16  ;;  %v287_v36 = vcvt.s32.f32 %v482_v29 }
  0x4a   :  { %v496_v44 = vadd.f32 -2.0, %v357_v2  ;;  %v246_v10 = vxor.u32 %v473_v6, %v222_v0 }
  0x4b   :  { %406 = vst [vmem:[#allocation7 + $0x20] sm:$0xff] %v398_v4  ;;  %v183_v53 = vxor.u32 %v458_v9, %v159_v3  ;;  %v295_v5 = vadd.f32 %v287_v36, %v263_v34 }
  0x4c   :  { %v373_v11 = vmul.f32 1.7320508, %v496_v44  ;;  %v302_v12 = vand.u32 65535, %v246_v10  ;;  %v489_v13 = vshrl.u32 %v246_v10, 16 }
  0x4d   :  { %v191_v17 = vmul.u32 2146121005, %v183_v53 }
  0x4e   :  { %v383_v14 = vmul.f32 %v589_v20, %v373_v11  ;;  %v310_v18 = vcvt.s32.f32 %v302_v12  ;;  %v342_v21 = vcvt.s32.f32 %v489_v13 }
  0x4f   :  { %v466_v22 = vshrl.u32 %v191_v17, 15 }
  0x50   :  { %v399_v24 = vadd.f32 %v391_v25, %v383_v14  ;;  %v318_v26 = vadd.f32 %v310_v18, %v294_v1 }
  0x51   :  { %v215_v27 = vxor.u32 %v466_v22, %v191_v17 }
  0x52   :  { %407 = vst [vmem:[#allocation7 + $0x28] sm:$0xff] %v399_v24  ;;  %v350_v30 = vadd.f32 %v342_v21, %v318_v26 }
  0x53   :  { %v223_v31 = vmul.u32 2221713035, %v215_v27 }
  0x54   :  { %v358_v32 = vmul.f32 1.5258789e-05, %v350_v30 }
  0x55   :  { %v474_v33 = vshrl.u32 %v223_v31, 16 }
  0x56   :  { %v497_v37 = vadd.f32 -2.0, %v358_v32 }
  0x57   :  { %v247_v38 = vxor.u32 %v474_v33, %v223_v31 }
  0x58   :  { %v374_v39 = vmul.f32 1.7320508, %v497_v37 }
  0x59   :  { %v303_v19 = vand.u32 65535, %v247_v38  ;;  %v490_v35 = vshrl.u32 %v247_v38, 16 }
  0x5a   :  { %v384_v28 = vmul.f32 %v589_v20, %v374_v39 }
  0x5b   :  { %v311_v41 = vcvt.s32.f32 %v303_v19  ;;  %v343_v15 = vcvt.s32.f32 %v490_v35 }
  0x5c   :  { %v400_v42 = vadd.f32 %v392_v40, %v384_v28 }
  0x5d   :  { %v319_v43 = vadd.f32 %v311_v41, %v295_v5 }
  0x5e   :  { %408 = vst [vmem:[#allocation7 + $0x30] sm:$0xff] %v400_v42 }
  0x5f   :  { %v351_v45 = vadd.f32 %v343_v15, %v319_v43 }
  0x61   :  { %v359_v46 = vmul.f32 1.5258789e-05, %v351_v45 }
  0x63   :  { %v498_v47 = vadd.f32 -2.0, %v359_v46 }
  0x65   :  { %v375_v48 = vmul.f32 1.7320508, %v498_v47 }
  0x67   :  { %v385_v50 = vmul.f32 %v589_v20, %v375_v48 }
  0x69   :  { %v401_v51 = vadd.f32 %v393_v49, %v385_v50 }
  0x6b   :  { %409 = vst [vmem:[#allocation7 + $0x38] sm:$0xff] %v401_v51 }
  0x6c   :  { %420 = dma.vmem_to_hbm [thread:$0]  %s416_s19, 1024, %s418_s22, [#allocation6]  }
  0x6d   :  { %551 = dma.done.wait [#allocation6], 1024  }
  0x6e   :  { %552 = vsyncadd [#allocation6], 4294966272 }
  0x6f   :  { %425 = vsyncpa [#allocation5], 1 }
  0x70   :  { %426 = vsyncpa [#allocation6], 1 }

</bundles_post_ra>
